<compile_context>
chip_gen: v6e
topology: v6e:2x2x1
jax: 0.10.0
libtpu: 0.0.40
codegen_flags: <defaults>
</compile_context>

<pallas_src>
import functools

import jax
import jax.numpy as jnp
from jax import lax
from jax.experimental import pallas as pl
from jax.experimental.pallas import tpu as pltpu


def _dice_kernel(p_ref, g_ref, num_ref, den_ref, *,
                 n_cols, tile_s, n_s_total, tiles_per_split, mask_tail):
    c = pl.program_id(0)           # spatial split (megacore "parallel")
    s = pl.program_id(2)           # spatial tile within split (reduction, last)
    gt = c * tiles_per_split + s   # global spatial tile index

    @pl.when(s == 0)
    def _():
        num_ref[...] = jnp.zeros_like(num_ref)
        den_ref[...] = jnp.zeros_like(den_ref)

    p = p_ref[...].astype(jnp.float32)
    g = g_ref[...].astype(jnp.float32)
    prod = p * g
    psum = p + g

    def _acc(pr, ps):
        # Per-row partials: one cross-lane reduce per block (XLU slot), and a
        # tiny (1, tile_r, 1) resident-output accumulator -> no full-block
        # load/store traffic in the hot loop.
        num_ref[...] += jnp.sum(pr, axis=1, keepdims=True)[None]
        den_ref[...] += jnp.sum(ps, axis=1, keepdims=True)[None]

    if mask_tail:
        is_tail = gt == n_s_total - 1

        @pl.when(is_tail)
        def _():
            # Only the globally last spatial tile reads past S -> zero out
            # the garbage lanes there; all other steps take the cheap path.
            col = lax.broadcasted_iota(jnp.int32, prod.shape, 1) + gt * tile_s
            valid = col < n_cols
            _acc(jnp.where(valid, prod, 0.0), jnp.where(valid, psum, 0.0))

        @pl.when(jnp.logical_not(is_tail))
        def _():
            _acc(prod, psum)
    else:
        _acc(prod, psum)


def dice_loss_pallas(p, g, n_dims, batch_dice=False, smooth=1e-5,
                     block_bytes=None):
    assert n_dims in (1, 2, 3)
    assert p.shape == g.shape
    assert p.ndim == n_dims + 2

    N, C = p.shape[0], p.shape[1]
    # Free reshape (contiguous), no HBM copy.  batch_dice grouping is done on
    # the tiny per-row partials after the kernel, so no transpose is needed.
    p2 = p.reshape(N * C, -1)
    g2 = g.reshape(N * C, -1)
    R, S = p2.shape
    dtype_bytes = jnp.dtype(p.dtype).itemsize

    # Per-generation VMEM budget: v5e/v6e have 128 MiB physical VMEM, v7x has
    # 64 MiB per TensorCore -> cap both the scoped limit and the block size.
    try:
        phys_vmem = pltpu.get_tpu_info().vmem_capacity_bytes
    except Exception:
        phys_vmem = 64 << 20          # conservative (v7x-sized) fallback
    if phys_vmem >= (100 << 20):      # v5e / v6e
        vmem_limit = 64 << 20
        auto_block_bytes = 6 << 20    # 2 inputs x 2 buffers x 6 MiB = 24 MiB
    else:                             # v7x
        vmem_limit = 48 << 20
        auto_block_bytes = 4 << 20    # 2 inputs x 2 buffers x 4 MiB = 16 MiB
    if block_bytes is None:
        block_bytes = auto_block_bytes

    LANE = 128
    MAX_TILE_R = 256  # multiple of 16 -> bf16 sublane packing friendly
    tile_r = R if R <= MAX_TILE_R else MAX_TILE_R  # full dim or multiple of 8

    # Largest lane-aligned spatial tile within the per-input block budget.
    per_row = max(LANE, block_bytes // (tile_r * dtype_bytes))
    if S <= per_row:
        tile_s = S          # full spatial extent in one block
        mask_tail = False
    else:
        tile_s = (per_row // LANE) * LANE
        mask_tail = (S % tile_s) != 0

    n_row_tiles = pl.cdiv(R, tile_r)
    n_s = pl.cdiv(S, tile_s)

    # 2-way spatial split across TensorCores (v7x megacore) when it divides
    # evenly; on single-TC chips the extra leading axis just serializes.
    n_splits = 2 if (n_s >= 2 and n_s % 2 == 0) else 1
    tiles_per_split = n_s // n_splits

    grid = (n_splits, n_row_tiles, tiles_per_split)

    kernel = functools.partial(
        _dice_kernel, n_cols=S, tile_s=tile_s, n_s_total=n_s,
        tiles_per_split=tiles_per_split, mask_tail=mask_tail)

    in_map = lambda c, i, s: (i, c * tiles_per_split + s)
    out_map = lambda c, i, s: (c, i, 0)

    num, den = pl.pallas_call(
        kernel,
        out_shape=(jax.ShapeDtypeStruct((n_splits, R, 1), jnp.float32),
                   jax.ShapeDtypeStruct((n_splits, R, 1), jnp.float32)),
        grid_spec=pltpu.PrefetchScalarGridSpec(
            num_scalar_prefetch=0,
            grid=grid,
            in_specs=[
                pl.BlockSpec((tile_r, tile_s), in_map),
                pl.BlockSpec((tile_r, tile_s), in_map),
            ],
            out_specs=[
                pl.BlockSpec((1, tile_r, 1), out_map),
                pl.BlockSpec((1, tile_r, 1), out_map),
            ],
        ),
        compiler_params=pltpu.CompilerParams(
            dimension_semantics=("parallel", "parallel", "arbitrary"),
            vmem_limit_bytes=vmem_limit,
        ),
    )(p2, g2)

    num = jnp.sum(num, axis=0)[:, 0]   # (R,) — sum the per-split partials
    den = jnp.sum(den, axis=0)[:, 0]
    if batch_dice:
        # Group the per-(n, c) partials by channel (sums over batch are cheap
        # on the [N*C]-sized result).
        num = num.reshape(N, C).sum(axis=0)
        den = den.reshape(N, C).sum(axis=0)

    dice = jnp.mean((2.0 * num + jnp.float32(smooth)) /
                    (den + jnp.float32(smooth)))
    return (1.0 - dice).astype(jnp.float32)


def dice_loss_ref(p, g, n_dims, batch_dice=False, smooth=1e-5):
    sum_dims = tuple(range(2, n_dims + 2))
    if batch_dice:
        sum_dims = (0,) + sum_dims
    pf = p.astype(jnp.float32)
    gf = g.astype(jnp.float32)
    num = jnp.sum(pf * gf, axis=sum_dims)
    den = jnp.sum(pf + gf, axis=sum_dims)
    dice = jnp.mean((2.0 * num + smooth) / (den + smooth))
    return 1.0 - dice


if __name__ == "__main__":
    key = jax.random.PRNGKey(0)
    k1, k2, k3, k4, k5, k6 = jax.random.split(key, 6)

    # Standard case: nDims=2 -> inputs are [N, C, H, W]; single spatial tile.
    N, C, H, W = 2, 4, 16, 16
    p = jax.random.uniform(k1, (N, C, H, W), dtype=jnp.float32)
    g = (jax.random.uniform(k2, (N, C, H, W)) > 0.5).astype(jnp.float32)
    for batch_dice in (False, True):
        loss = jax.block_until_ready(
            dice_loss_pallas(p, g, n_dims=2, batch_dice=batch_dice))
        ref = dice_loss_ref(p, g, n_dims=2, batch_dice=batch_dice)
        assert jnp.allclose(loss, ref, rtol=1e-5, atol=1e-5), (batch_dice, loss, ref)

    # bf16 inputs pass through unconverted (upcast happens in-kernel).
    loss = jax.block_until_ready(
        dice_loss_pallas(p.astype(jnp.bfloat16), g.astype(jnp.bfloat16), n_dims=2))
    ref = dice_loss_ref(p.astype(jnp.bfloat16), g.astype(jnp.bfloat16), n_dims=2)
    assert jnp.allclose(loss, ref, rtol=1e-4, atol=1e-4), (loss, ref)

    # Ragged rows + ragged spatial tail + 2-way spatial split:
    # R=3 (not a multiple of 8), S=385 (not a multiple of 128); tiny block
    # budget forces tile_s=128 -> 4 spatial tiles -> n_splits=2, masked tail.
    pr_ = jax.random.uniform(k3, (1, 3, 5, 77), dtype=jnp.float32)
    gr_ = (jax.random.uniform(k4, (1, 3, 5, 77)) > 0.5).astype(jnp.float32)
    for batch_dice in (False, True):
        loss = jax.block_until_ready(
            dice_loss_pallas(pr_, gr_, n_dims=2, batch_dice=batch_dice,
                             block_bytes=2048))
        ref = dice_loss_ref(pr_, gr_, n_dims=2, batch_dice=batch_dice)
        assert jnp.allclose(loss, ref, rtol=1e-5, atol=1e-5), (batch_dice, loss, ref)

    # Odd number of spatial tiles (no split) + masked tail: S=300 -> 3 tiles.
    po = jax.random.uniform(k5, (1, 3, 4, 75), dtype=jnp.float32)
    go = (jax.random.uniform(k6, (1, 3, 4, 75)) > 0.5).astype(jnp.float32)
    loss = jax.block_until_ready(dice_loss_pallas(po, go, n_dims=2, block_bytes=2048))
    ref = dice_loss_ref(po, go, n_dims=2)
    assert jnp.allclose(loss, ref, rtol=1e-5, atol=1e-5), (loss, ref)

    # nDims=1 and nDims=3 shapes.
    p1 = jax.random.uniform(k1, (2, 4, 33), dtype=jnp.float32)
    g1 = (jax.random.uniform(k2, (2, 4, 33)) > 0.5).astype(jnp.float32)
    loss = jax.block_until_ready(dice_loss_pallas(p1, g1, n_dims=1))
    ref = dice_loss_ref(p1, g1, n_dims=1)
    assert jnp.allclose(loss, ref, rtol=1e-5, atol=1e-5), (loss, ref)

    p3 = jax.random.uniform(k3, (2, 3, 4, 5, 6), dtype=jnp.float32)
    g3 = (jax.random.uniform(k4, (2, 3, 4, 5, 6)) > 0.5).astype(jnp.float32)
    loss = jax.block_until_ready(
        dice_loss_pallas(p3, g3, n_dims=3, batch_dice=True))
    ref = dice_loss_ref(p3, g3, n_dims=3, batch_dice=True)
    assert jnp.allclose(loss, ref, rtol=1e-5, atol=1e-5), (loss, ref)

    print("KERNEL_OK")
</pallas_src>

<mosaic_0001>
module attributes {stable_mosaic.version = 11 : i64} {
  func.func @_dice_kernel(%arg0: i32, %arg1: i32, %arg2: i32, %arg3: memref<8x256xf32, #tpu.memory_space<vmem>>, %arg4: memref<8x256xf32, #tpu.memory_space<vmem>>, %arg5: memref<1x8x1xf32, #tpu.memory_space<vmem>>, %arg6: memref<1x8x1xf32, #tpu.memory_space<vmem>>) attributes {dimension_semantics = [#tpu.dimension_semantics<parallel>, #tpu.dimension_semantics<parallel>, #tpu.dimension_semantics<arbitrary>], iteration_bounds = array<i64: 1, 1, 1>, scalar_prefetch = 0 : i64, scratch_operands = 0 : i64, tpu.core_type = #tpu.core_type<tc>, window_params = [{transform_indices = @transform_0, window_bounds = array<i64: 8, 256>}, {transform_indices = @transform_1, window_bounds = array<i64: 8, 256>}, {transform_indices = @transform_2, window_bounds = array<i64: 1, 8, 1>}, {transform_indices = @transform_3, window_bounds = array<i64: 1, 8, 1>}]} {
    %c0_i32 = arith.constant 0 : i32
    %0 = arith.cmpi eq, %arg2, %c0_i32 : i32
    %1 = arith.extui %0 : i1 to i32
    %c0_i32_0 = arith.constant 0 : i32
    %2 = arith.cmpi ne, %1, %c0_i32_0 : i32
    scf.if %2 {
      %cst_17 = arith.constant 0.000000e+00 : f32
      %19 = vector.broadcast %cst_17 : f32 to vector<1x8x1xf32>
      %c0_18 = arith.constant 0 : index
      %c0_19 = arith.constant 0 : index
      %c0_20 = arith.constant 0 : index
      %20 = vector.load %arg5[%c0_18, %c0_19, %c0_20] : memref<1x8x1xf32, #tpu.memory_space<vmem>>, vector<1x8x1xf32>
      tpu.vector_store %arg5[%c0_18, %c0_19, %c0_20], %19 {strides = array<i32>} : memref<1x8x1xf32, #tpu.memory_space<vmem>>, vector<1x8x1xf32>,
      %cst_21 = arith.constant 0.000000e+00 : f32
      %21 = vector.broadcast %cst_21 : f32 to vector<1x8x1xf32>
      %c0_22 = arith.constant 0 : index
      %c0_23 = arith.constant 0 : index
      %c0_24 = arith.constant 0 : index
      %22 = vector.load %arg6[%c0_22, %c0_23, %c0_24] : memref<1x8x1xf32, #tpu.memory_space<vmem>>, vector<1x8x1xf32>
      tpu.vector_store %arg6[%c0_22, %c0_23, %c0_24], %21 {strides = array<i32>} : memref<1x8x1xf32, #tpu.memory_space<vmem>>, vector<1x8x1xf32>,
    } else {
    }
    %c0 = arith.constant 0 : index
    %c0_1 = arith.constant 0 : index
    %3 = vector.load %arg3[%c0, %c0_1] : memref<8x256xf32, #tpu.memory_space<vmem>>, vector<8x256xf32>
    %c0_2 = arith.constant 0 : index
    %c0_3 = arith.constant 0 : index
    %4 = vector.load %arg4[%c0_2, %c0_3] : memref<8x256xf32, #tpu.memory_space<vmem>>, vector<8x256xf32>
    %5 = arith.mulf %3, %4 : vector<8x256xf32>
    %6 = arith.addf %3, %4 : vector<8x256xf32>
    %c0_4 = arith.constant 0 : index
    %c0_5 = arith.constant 0 : index
    %c0_6 = arith.constant 0 : index
    %7 = vector.load %arg5[%c0_4, %c0_5, %c0_6] : memref<1x8x1xf32, #tpu.memory_space<vmem>>, vector<1x8x1xf32>
    %cst = arith.constant dense<0.000000e+00> : vector<8xf32>
    %8 = vector.multi_reduction <add>, %5, %cst [1] : vector<8x256xf32> to vector<8xf32>
    %9 = vector.shape_cast %8 : vector<8xf32> to vector<8x1xf32>
    %10 = vector.shape_cast %9 : vector<8x1xf32> to vector<1x8x1xf32>
    %11 = arith.addf %7, %10 : vector<1x8x1xf32>
    %c0_7 = arith.constant 0 : index
    %c0_8 = arith.constant 0 : index
    %c0_9 = arith.constant 0 : index
    %12 = vector.load %arg5[%c0_7, %c0_8, %c0_9] : memref<1x8x1xf32, #tpu.memory_space<vmem>>, vector<1x8x1xf32>
    tpu.vector_store %arg5[%c0_7, %c0_8, %c0_9], %11 {strides = array<i32>} : memref<1x8x1xf32, #tpu.memory_space<vmem>>, vector<1x8x1xf32>,
    %c0_10 = arith.constant 0 : index
    %c0_11 = arith.constant 0 : index
    %c0_12 = arith.constant 0 : index
    %13 = vector.load %arg6[%c0_10, %c0_11, %c0_12] : memref<1x8x1xf32, #tpu.memory_space<vmem>>, vector<1x8x1xf32>
    %cst_13 = arith.constant dense<0.000000e+00> : vector<8xf32>
    %14 = vector.multi_reduction <add>, %6, %cst_13 [1] : vector<8x256xf32> to vector<8xf32>
    %15 = vector.shape_cast %14 : vector<8xf32> to vector<8x1xf32>
    %16 = vector.shape_cast %15 : vector<8x1xf32> to vector<1x8x1xf32>
    %17 = arith.addf %13, %16 : vector<1x8x1xf32>
    %c0_14 = arith.constant 0 : index
    %c0_15 = arith.constant 0 : index
    %c0_16 = arith.constant 0 : index
    %18 = vector.load %arg6[%c0_14, %c0_15, %c0_16] : memref<1x8x1xf32, #tpu.memory_space<vmem>>, vector<1x8x1xf32>
    tpu.vector_store %arg6[%c0_14, %c0_15, %c0_16], %17 {strides = array<i32>} : memref<1x8x1xf32, #tpu.memory_space<vmem>>, vector<1x8x1xf32>,
    return
  }
  func.func @transform_0(%arg0: i32, %arg1: i32, %arg2: i32) -> (i32, i32) {
    %c1_i32 = arith.constant 1 : i32
    %0 = arith.muli %arg0, %c1_i32 : i32
    %1 = arith.addi %0, %arg2 : i32
    %c0_i32 = arith.constant 0 : i32
    return %arg1, %1 : i32, i32
  }
  func.func @transform_1(%arg0: i32, %arg1: i32, %arg2: i32) -> (i32, i32) {
    %c1_i32 = arith.constant 1 : i32
    %0 = arith.muli %arg0, %c1_i32 : i32
    %1 = arith.addi %0, %arg2 : i32
    %c0_i32 = arith.constant 0 : i32
    return %arg1, %1 : i32, i32
  }
  func.func @transform_2(%arg0: i32, %arg1: i32, %arg2: i32) -> (i32, i32, i32) {
    %c0_i32 = arith.constant 0 : i32
    %c0_i32_0 = arith.constant 0 : i32
    return %arg0, %arg1, %c0_i32 : i32, i32, i32
  }
  func.func @transform_3(%arg0: i32, %arg1: i32, %arg2: i32) -> (i32, i32, i32) {
    %c0_i32 = arith.constant 0 : i32
    %c0_i32_0 = arith.constant 0 : i32
    return %arg0, %arg1, %c0_i32 : i32, i32, i32
  }
}

</mosaic_0001>

<bundles_post_ra>
// kernel: tpu_custom_call.1
= control target key start
LH: loop header
LB: loop body
LE: loop exit
PB: predicated region body
PF: predicated region fallthrough
CT: control target
= control target key end

     0   :  { %9 = vsyncpa [#allocation3], 0  ;;  %s185_s0 = inlined_call_operand.hbm [shape: f32[8,256], index: 0, kind: input, shape index: {}]   ;;  %s186_s1 = inlined_call_operand.hbm [shape: f32[8,256], index: 1, kind: input, shape index: {}]   ;;  %s187_s2 = inlined_call_operand.vmem [shape: f32[1,8,1], index: 2, kind: output, shape index: {0}]   ;;  %s188_s3 = inlined_call_operand.vmem [shape: f32[1,8,1], index: 3, kind: output, shape index: {1}]  }
   0x1   :  { %10 = vsyncpa [#allocation5], 0  ;;  %s134_s12 = smov [#allocation2]   ;;  %s135_s14 = smov [#allocation4]  }
   0x2   :  { %s21_s13 = sshll.u32 %s134_s12, 4  ;;  %s35_s15 = sshll.u32 %s135_s14, 4  ;;  %s22_s13 = int_to_ptr.vmem [resolvable:$true] %s21_s13  ;;  %s36_s15 = int_to_ptr.vmem [resolvable:$true] %s35_s15 }
   0x3   :  { %s98_s16 = scalar_lea.vmem %s22_s13, 256  ;;  %p103_p1 = scmp.lt.s32.totalorder %s22_s13, %s22_s13 }
   0x4   :  { %p99_p0 = scmp.ne.s32.totalorder %s22_s13, %s98_s16  ;;  %p104_p2 = scmp.lt.s32.totalorder %s98_s16, %s98_s16 }
   0x6   :  { %p105_p3 = por %p104_p2, %p103_p1 }
   0x8   :  { %p106_p4 = pnand %p105_p3, %p99_p0 }
   0xa   :  { %109 = shalt.err (!%p106_p4)
}
   0xb   :  { %24 = dma.hbm_to_vmem [thread:$0]  %s185_s0, 256, %s22_s13, [#allocation3]  }
   0xc   :  { %s118_s19 = scalar_lea.vmem %s36_s15, 256  ;;  %p123_p6 = scmp.lt.s32.totalorder %s36_s15, %s36_s15 }
   0xd   :  { %p119_p5 = scmp.ne.s32.totalorder %s36_s15, %s118_s19  ;;  %p124_p7 = scmp.lt.s32.totalorder %s118_s19, %s118_s19 }
   0xf   :  { %p125_p8 = por %p124_p7, %p123_p6 }
  0x11   :  { %p126_p9 = pnand %p125_p8, %p119_p5 }
  0x13   :  { %129 = shalt.err (!%p126_p9)
}
  0x14   :  { %38 = dma.hbm_to_vmem [thread:$0]  %s186_s1, 256, %s36_s15, [#allocation5]  }
  0x15   :  { %130 = dma.done.wait [#allocation3], 256  }
  0x16   :  { %131 = vsyncadd [#allocation3], 4294967040 }
  0x17   :  { %132 = dma.done.wait [#allocation5], 256  }
  0x18   :  { %133 = vsyncadd [#allocation5], 4294967040  ;;  %vm53_vm0 = vcmask 7168   ;;  %v136_v0 = vmov 0.0   ;;  %v56_v1 = vld [vmem:[#allocation2] sm:$0xff]  ;;  %v57_v2 = vld [vmem:[#allocation2 + $0x8] sm:$0xff] }
  0x19   :  { %54 = vst.msk [vmem:[%s187_s2] sm:$0xff] %vm53_vm0, %v136_v0  ;;  %55 = vst.msk [vmem:[%s188_s3] sm:$0xff] %vm53_vm0, %v136_v0  ;;  %v58_v3 = vld [vmem:[#allocation4] sm:$0xff]  ;;  %v59_v4 = vld [vmem:[#allocation4 + $0x8] sm:$0xff] }
  0x1a   :  { %v60_v5 = vmul.f32 %v58_v3, %v56_v1  ;;  %v61_v6 = vmul.f32 %v59_v4, %v57_v2  ;;  %v62_v7 = vadd.f32 %v58_v3, %v56_v1  ;;  %v63_v8 = vadd.f32 %v59_v4, %v57_v2 }
  0x1c   :  { %v65_v9 = vadd.f32 %v61_v6, %v60_v5  ;;  %v72_v10 = vadd.f32 %v63_v8, %v62_v7 }
  0x1e   :  { %66 = vadd.xlane.f32.xlu0 %v65_v9 }
  0x20   :  { %v64_v11 = vld [vmem:[%s187_s2] sm:$0xff] }
  0x21   :  { %v71_v14 = vld [vmem:[%s188_s3] sm:$0xff] }
  0x22   :  { %73 = vadd.xlane.f32.xlu0 %v72_v10 }
  0xa7   :  { %v67_v12 = vpop.xlane.xlu0 %66 }
  0xa8   :  { %v68_v13 = vadd.f32 %v67_v12, %v64_v11 }
  0xaa   :  { %70 = vst.msk [vmem:[%s187_s2] sm:$0xff] %vm53_vm0, %v68_v13 }
  0xab   :  { %v74_v15 = vpop.xlane.xlu0 %73 }
  0xac   :  { %v75_v16 = vadd.f32 %v74_v15, %v71_v14 }
  0xae   :  { %76 = vst.msk [vmem:[%s188_s3] sm:$0xff] %vm53_vm0, %v75_v16 }
  0xaf   :  { %85 = vsyncpa [#allocation3], 1 }
  0xb0   :  { %86 = vsyncpa [#allocation5], 1 }

</bundles_post_ra>
